<compile_context>
chip_gen: v5e
topology: v5e:2x2
jax: 0.10.0
libtpu: 0.0.40
codegen_flags: <defaults>
</compile_context>

<pallas_src>
import jax
import jax.numpy as jnp
from jax.experimental import pallas as pl
from jax.experimental.pallas import tpu as pltpu


def _gelu_tanh(x):
    # tanh-approx GELU (EUP tanh, avoids erf lowering concerns)
    c = 0.7978845608028654  # sqrt(2/pi)
    return 0.5 * x * (1.0 + jnp.tanh(c * (x + 0.044715 * x * x * x)))


def _fused_stack_kernel(x_ref, mask_ref, gamma_ref, beta_ref,
                        w1_ref, b1_ref, w2_ref, b2_ref, o_ref, acc_ref):
    """Grid = (row_tiles, L).  For each row tile, iterate the L child blocks
    with the activation tile resident in the f32 VMEM scratch `acc_ref`.

    Per block:  y = mask * (x + W2 @ gelu(W1 @ LN(x)))   (bf16 MXU, f32 acc)
    """
    l = pl.program_id(1)

    # First block: load the input rows into the resident accumulator.
    @pl.when(l == 0)
    def _():
        acc_ref[...] = x_ref[...].astype(jnp.float32)

    x = acc_ref[...]                                         # [tm, D] f32

    # LayerNorm over last dim (eps matches torch.nn.LayerNorm default 1e-5)
    mu = jnp.mean(x, axis=-1, keepdims=True)
    xc = x - mu
    var = jnp.mean(xc * xc, axis=-1, keepdims=True)
    xn = xc * jax.lax.rsqrt(var + 1e-5)
    xn = xn * gamma_ref[...].astype(jnp.float32) + beta_ref[...].astype(jnp.float32)

    # MLP: bf16 operands into the MXU, f32 accumulation.
    h = jnp.dot(xn.astype(jnp.bfloat16), w1_ref[...],
                preferred_element_type=jnp.float32) + b1_ref[...].astype(jnp.float32)
    h = _gelu_tanh(h)
    y = jnp.dot(h.astype(jnp.bfloat16), w2_ref[...],
                preferred_element_type=jnp.float32) + b2_ref[...].astype(jnp.float32)

    # residual + padding mask (mask re-applied after every block, matching the
    # per-child semantics of the unfused version)
    y = (x + y) * mask_ref[...].astype(jnp.float32)
    acc_ref[...] = y

    # Last block: write the tile back out (output block index is constant in l,
    # so the out buffer is VMEM-resident across the whole l sweep).
    @pl.when(l == pl.num_programs(1) - 1)
    def _():
        o_ref[...] = y.astype(o_ref.dtype)


def _round_up(n, m):
    return pl.cdiv(n, m) * m


def _fused_call(x2d, mask2d, p, *, tm):
    """x2d: [R, D] f32 (R a multiple of tm), mask2d: [R, 1] f32,
    p: dict of stacked per-block params with leading L axis."""
    R, D = x2d.shape
    L, _, H = p["w1"].shape
    grid = (R // tm, L)

    return pl.pallas_call(
        _fused_stack_kernel,
        out_shape=jax.ShapeDtypeStruct((R, D), x2d.dtype),
        grid_spec=pltpu.PrefetchScalarGridSpec(
            num_scalar_prefetch=0,
            grid=grid,
            in_specs=[
                pl.BlockSpec((tm, D), lambda i, l: (i, 0)),        # x rows (fetched once per i)
                pl.BlockSpec((tm, 1), lambda i, l: (i, 0)),        # mask rows
                pl.BlockSpec((None, 1, D), lambda i, l: (l, 0, 0)),  # gamma[l]
                pl.BlockSpec((None, 1, D), lambda i, l: (l, 0, 0)),  # beta[l]
                pl.BlockSpec((None, D, H), lambda i, l: (l, 0, 0)),  # w1[l]  (bf16)
                pl.BlockSpec((None, 1, H), lambda i, l: (l, 0, 0)),  # b1[l]
                pl.BlockSpec((None, H, D), lambda i, l: (l, 0, 0)),  # w2[l]  (bf16)
                pl.BlockSpec((None, 1, D), lambda i, l: (l, 0, 0)),  # b2[l]
            ],
            out_specs=pl.BlockSpec((tm, D), lambda i, l: (i, 0)),
            scratch_shapes=[pltpu.VMEM((tm, D), jnp.float32)],      # resident activations
        ),
        compiler_params=pltpu.CompilerParams(
            dimension_semantics=("parallel", "arbitrary"),
            vmem_limit_bytes=64 * 1024 * 1024,
        ),
    )(x2d, mask2d, p["gamma"], p["beta"], p["w1"], p["b1"], p["w2"], p["b2"])


def custom_sequential(x, blocks, mask=None, attn_mask=None, *, tile_rows=512):
    """Pallas equivalent of CustomSequential.forward.

    x:         [B, S, D] float32
    blocks:    list of per-child parameter dicts (the nn.ModuleList contents)
    mask:      optional [B, S] (1 = keep, 0 = pad)
    attn_mask: accepted and threaded for signature parity (unused by the
               representative MLP child).
    """
    del attn_mask  # TODO(synk): unused by the representative MLP child.
    B, S, D = x.shape
    R = B * S
    x2d = x.reshape(R, D)
    if mask is None:
        mask2d = jnp.ones((R, 1), dtype=x.dtype)
    else:
        mask2d = mask.reshape(R, 1).astype(x.dtype)

    # Row-tile choice: as large as reasonable, sublane-aligned, no bigger than
    # the (8-rounded) row count; pad the tail rows so the grid covers all rows.
    tm = min(int(_round_up(tile_rows, 8)), int(_round_up(R, 8)))
    R_pad = int(_round_up(R, tm))
    if R_pad != R:
        x2d = jnp.pad(x2d, ((0, R_pad - R), (0, 0)))
        mask2d = jnp.pad(mask2d, ((0, R_pad - R), (0, 0)))   # padded rows masked to 0

    # Stack the per-block params along a leading L axis (fused kernel iterates it).
    stacked = {k: jnp.stack([b[k] for b in blocks], axis=0) for k in blocks[0]}

    out = _fused_call(x2d, mask2d, stacked, tm=tm)
    return out[:R].reshape(B, S, D)


def _init_block_params(key, D, H):
    k1, k2 = jax.random.split(key)
    return {
        "gamma": jnp.ones((1, D), jnp.float32),
        "beta": jnp.zeros((1, D), jnp.float32),
        # bf16 weights: feed the MXU bf16 (f32 accumulation in-kernel).
        "w1": (jax.random.normal(k1, (D, H), jnp.float32)
               * (1.0 / jnp.sqrt(D))).astype(jnp.bfloat16),
        "b1": jnp.zeros((1, H), jnp.float32),
        "w2": (jax.random.normal(k2, (H, D), jnp.float32)
               * (1.0 / jnp.sqrt(H))).astype(jnp.bfloat16),
        "b2": jnp.zeros((1, D), jnp.float32),
    }


def _reference(x, blocks, mask):
    """Pure-JAX reference of the same sequential stack (for a sanity check)."""
    B, S, D = x.shape
    m = mask.reshape(B, S, 1).astype(jnp.float32)
    y = x.astype(jnp.float32)
    for p in blocks:
        mu = jnp.mean(y, axis=-1, keepdims=True)
        xc = y - mu
        var = jnp.mean(xc * xc, axis=-1, keepdims=True)
        xn = xc * jax.lax.rsqrt(var + 1e-5)
        xn = xn * p["gamma"].reshape(1, 1, D) + p["beta"].reshape(1, 1, D)
        h = jnp.dot(xn.astype(jnp.bfloat16).reshape(-1, D), p["w1"],
                    preferred_element_type=jnp.float32)
        h = h.reshape(B, S, -1) + p["b1"].reshape(1, 1, -1)
        h = _gelu_tanh(h)
        o = jnp.dot(h.astype(jnp.bfloat16).reshape(B * S, -1), p["w2"],
                    preferred_element_type=jnp.float32)
        o = o.reshape(B, S, D) + p["b2"].reshape(1, 1, D)
        y = (y + o) * m
    return y


if __name__ == "__main__":
    # Small but lane-aligned demo shapes (D multiple of 128 -> dense stores).
    B, S, D, H = 2, 8, 128, 256
    n_blocks = 2

    root = jax.random.PRNGKey(0)
    kx, km, *kblocks = jax.random.split(root, 2 + n_blocks)

    x = jax.random.normal(kx, (B, S, D), jnp.float32)
    # simple padding mask: last 2 positions of each sequence are padding
    mask = (jnp.arange(S)[None, :] < (S - 2)).astype(jnp.float32)
    mask = jnp.broadcast_to(mask, (B, S))

    blocks = [_init_block_params(k, D, H) for k in kblocks]

    out = custom_sequential(x, blocks, mask=mask, attn_mask=None)
    jax.block_until_ready(out)

    # sanity checks
    assert out.shape == (B, S, D)
    assert bool(jnp.all(out[:, S - 2:, :] == 0.0))       # masked positions exactly zero
    ref = _reference(x, blocks, mask)
    max_err = float(jnp.max(jnp.abs(out - ref)))
    assert max_err < 5e-2, f"mismatch vs reference: {max_err}"

    print("KERNEL_OK")
</pallas_src>

<mosaic_0001>
module attributes {stable_mosaic.version = 11 : i64} {
  func.func @_fused_stack_kernel(%arg0: i32, %arg1: i32, %arg2: memref<16x128xf32, #tpu.memory_space<vmem>>, %arg3: memref<16x1xf32, #tpu.memory_space<vmem>>, %arg4: memref<1x1x128xf32, #tpu.memory_space<vmem>>, %arg5: memref<1x1x128xf32, #tpu.memory_space<vmem>>, %arg6: memref<1x128x256xbf16, #tpu.memory_space<vmem>>, %arg7: memref<1x1x256xf32, #tpu.memory_space<vmem>>, %arg8: memref<1x256x128xbf16, #tpu.memory_space<vmem>>, %arg9: memref<1x1x128xf32, #tpu.memory_space<vmem>>, %arg10: memref<16x128xf32, #tpu.memory_space<vmem>>, %arg11: memref<16x128xf32, #tpu.memory_space<vmem>>) attributes {dimension_semantics = [#tpu.dimension_semantics<parallel>, #tpu.dimension_semantics<arbitrary>], iteration_bounds = array<i64: 1, 2>, scalar_prefetch = 0 : i64, scratch_operands = 1 : i64, tpu.core_type = #tpu.core_type<tc>, window_params = [{transform_indices = @transform_0, window_bounds = array<i64: 16, 128>}, {transform_indices = @transform_1, window_bounds = array<i64: 16, 1>}, {transform_indices = @transform_2, window_bounds = array<i64: 1, 1, 128>}, {transform_indices = @transform_3, window_bounds = array<i64: 1, 1, 128>}, {transform_indices = @transform_4, window_bounds = array<i64: 1, 128, 256>}, {transform_indices = @transform_5, window_bounds = array<i64: 1, 1, 256>}, {transform_indices = @transform_6, window_bounds = array<i64: 1, 256, 128>}, {transform_indices = @transform_7, window_bounds = array<i64: 1, 1, 128>}, {transform_indices = @transform_8, window_bounds = array<i64: 16, 128>}]} {
    %c0_i32 = arith.constant 0 : i32
    %0 = arith.cmpi eq, %arg1, %c0_i32 : i32
    %1 = arith.extui %0 : i1 to i32
    %c0_i32_0 = arith.constant 0 : i32
    %2 = arith.cmpi ne, %1, %c0_i32_0 : i32
    scf.if %2 {
      %c0_35 = arith.constant 0 : index
      %c0_36 = arith.constant 0 : index
      %65 = vector.load %arg2[%c0_35, %c0_36] : memref<16x128xf32, #tpu.memory_space<vmem>>, vector<16x128xf32>
      %c0_37 = arith.constant 0 : index
      %c0_38 = arith.constant 0 : index
      %66 = vector.load %arg11[%c0_37, %c0_38] : memref<16x128xf32, #tpu.memory_space<vmem>>, vector<16x128xf32>
      tpu.vector_store %arg11[%c0_37, %c0_38], %65 {strides = array<i32>} : memref<16x128xf32, #tpu.memory_space<vmem>>, vector<16x128xf32>,
    } else {
    }
    %c0 = arith.constant 0 : index
    %c0_1 = arith.constant 0 : index
    %3 = vector.load %arg11[%c0, %c0_1] : memref<16x128xf32, #tpu.memory_space<vmem>>, vector<16x128xf32>
    %cst = arith.constant dense<0.000000e+00> : vector<16xf32>
    %4 = vector.multi_reduction <add>, %3, %cst [1] : vector<16x128xf32> to vector<16xf32>
    %5 = vector.shape_cast %4 : vector<16xf32> to vector<16x1xf32>
    %cst_2 = arith.constant 1.280000e+02 : f32
    %6 = vector.broadcast %cst_2 : f32 to vector<16x1xf32>
    %7 = arith.divf %5, %6 : vector<16x1xf32>
    %8 = vector.broadcast %7 : vector<16x1xf32> to vector<16x128xf32>
    %9 = arith.subf %3, %8 : vector<16x128xf32>
    %10 = arith.mulf %9, %9 : vector<16x128xf32>
    %cst_3 = arith.constant dense<0.000000e+00> : vector<16xf32>
    %11 = vector.multi_reduction <add>, %10, %cst_3 [1] : vector<16x128xf32> to vector<16xf32>
    %12 = vector.shape_cast %11 : vector<16xf32> to vector<16x1xf32>
    %cst_4 = arith.constant 1.280000e+02 : f32
    %13 = vector.broadcast %cst_4 : f32 to vector<16x1xf32>
    %14 = arith.divf %12, %13 : vector<16x1xf32>
    %cst_5 = arith.constant 9.99999974E-6 : f32
    %15 = vector.broadcast %cst_5 : f32 to vector<16x1xf32>
    %16 = arith.addf %14, %15 : vector<16x1xf32>
    %17 = math.rsqrt %16 : vector<16x1xf32>
    %18 = vector.broadcast %17 : vector<16x1xf32> to vector<16x128xf32>
    %19 = arith.mulf %9, %18 : vector<16x128xf32>
    %c0_6 = arith.constant 0 : index
    %c0_7 = arith.constant 0 : index
    %c0_8 = arith.constant 0 : index
    %20 = vector.load %arg4[%c0_6, %c0_7, %c0_8] : memref<1x1x128xf32, #tpu.memory_space<vmem>>, vector<1x1x128xf32>
    %21 = vector.shape_cast %20 : vector<1x1x128xf32> to vector<1x128xf32>
    %22 = vector.broadcast %21 : vector<1x128xf32> to vector<16x128xf32>
    %23 = arith.mulf %19, %22 : vector<16x128xf32>
    %c0_9 = arith.constant 0 : index
    %c0_10 = arith.constant 0 : index
    %c0_11 = arith.constant 0 : index
    %24 = vector.load %arg5[%c0_9, %c0_10, %c0_11] : memref<1x1x128xf32, #tpu.memory_space<vmem>>, vector<1x1x128xf32>
    %25 = vector.shape_cast %24 : vector<1x1x128xf32> to vector<1x128xf32>
    %26 = vector.broadcast %25 : vector<1x128xf32> to vector<16x128xf32>
    %27 = arith.addf %23, %26 : vector<16x128xf32>
    %28 = arith.truncf %27 : vector<16x128xf32> to vector<16x128xbf16>
    %c0_12 = arith.constant 0 : index
    %c0_13 = arith.constant 0 : index
    %c0_14 = arith.constant 0 : index
    %29 = vector.load %arg6[%c0_12, %c0_13, %c0_14] : memref<1x128x256xbf16, #tpu.memory_space<vmem>>, vector<1x128x256xbf16>
    %30 = vector.shape_cast %29 : vector<1x128x256xbf16> to vector<128x256xbf16>
    %cst_15 = arith.constant dense<0.000000e+00> : vector<16x256xf32>
    %31 = tpu.matmul %28, %30, %cst_15 {dimension_numbers = #tpu.dot_dimension_numbers<[1], [0], [0], [1], [0, 0, 1, 1], [], []>} : vector<16x128xbf16>, vector<128x256xbf16>, vector<16x256xf32> -> vector<16x256xf32>
    %c0_16 = arith.constant 0 : index
    %c0_17 = arith.constant 0 : index
    %c0_18 = arith.constant 0 : index
    %32 = vector.load %arg7[%c0_16, %c0_17, %c0_18] : memref<1x1x256xf32, #tpu.memory_space<vmem>>, vector<1x1x256xf32>
    %33 = vector.shape_cast %32 : vector<1x1x256xf32> to vector<1x256xf32>
    %34 = vector.broadcast %33 : vector<1x256xf32> to vector<16x256xf32>
    %35 = arith.addf %31, %34 : vector<16x256xf32>
    %cst_19 = arith.constant 5.000000e-01 : f32
    %36 = vector.broadcast %cst_19 : f32 to vector<16x256xf32>
    %37 = arith.mulf %36, %35 : vector<16x256xf32>
    %cst_20 = arith.constant 4.471500e-02 : f32
    %38 = vector.broadcast %cst_20 : f32 to vector<16x256xf32>
    %39 = arith.mulf %38, %35 : vector<16x256xf32>
    %40 = arith.mulf %39, %35 : vector<16x256xf32>
    %41 = arith.mulf %40, %35 : vector<16x256xf32>
    %42 = arith.addf %35, %41 : vector<16x256xf32>
    %cst_21 = arith.constant 0.797884583 : f32
    %43 = vector.broadcast %cst_21 : f32 to vector<16x256xf32>
    %44 = arith.mulf %43, %42 : vector<16x256xf32>
    %45 = math.tanh %44 : vector<16x256xf32>
    %cst_22 = arith.constant 1.000000e+00 : f32
    %46 = vector.broadcast %cst_22 : f32 to vector<16x256xf32>
    %47 = arith.addf %46, %45 : vector<16x256xf32>
    %48 = arith.mulf %37, %47 : vector<16x256xf32>
    %49 = arith.truncf %48 : vector<16x256xf32> to vector<16x256xbf16>
    %c0_23 = arith.constant 0 : index
    %c0_24 = arith.constant 0 : index
    %c0_25 = arith.constant 0 : index
    %50 = vector.load %arg8[%c0_23, %c0_24, %c0_25] : memref<1x256x128xbf16, #tpu.memory_space<vmem>>, vector<1x256x128xbf16>
    %51 = vector.shape_cast %50 : vector<1x256x128xbf16> to vector<256x128xbf16>
    %cst_26 = arith.constant dense<0.000000e+00> : vector<16x128xf32>
    %52 = tpu.matmul %49, %51, %cst_26 {dimension_numbers = #tpu.dot_dimension_numbers<[1], [0], [0], [1], [0, 0, 1, 1], [], []>} : vector<16x256xbf16>, vector<256x128xbf16>, vector<16x128xf32> -> vector<16x128xf32>
    %c0_27 = arith.constant 0 : index
    %c0_28 = arith.constant 0 : index
    %c0_29 = arith.constant 0 : index
    %53 = vector.load %arg9[%c0_27, %c0_28, %c0_29] : memref<1x1x128xf32, #tpu.memory_space<vmem>>, vector<1x1x128xf32>
    %54 = vector.shape_cast %53 : vector<1x1x128xf32> to vector<1x128xf32>
    %55 = vector.broadcast %54 : vector<1x128xf32> to vector<16x128xf32>
    %56 = arith.addf %52, %55 : vector<16x128xf32>
    %57 = arith.addf %3, %56 : vector<16x128xf32>
    %c0_30 = arith.constant 0 : index
    %c0_31 = arith.constant 0 : index
    %58 = vector.load %arg3[%c0_30, %c0_31] : memref<16x1xf32, #tpu.memory_space<vmem>>, vector<16x1xf32>
    %59 = vector.broadcast %58 : vector<16x1xf32> to vector<16x128xf32>
    %60 = arith.mulf %57, %59 : vector<16x128xf32>
    %c0_32 = arith.constant 0 : index
    %c0_33 = arith.constant 0 : index
    %61 = vector.load %arg11[%c0_32, %c0_33] : memref<16x128xf32, #tpu.memory_space<vmem>>, vector<16x128xf32>
    tpu.vector_store %arg11[%c0_32, %c0_33], %60 {strides = array<i32>} : memref<16x128xf32, #tpu.memory_space<vmem>>, vector<16x128xf32>,
    %c1_i32 = arith.constant 1 : i32
    %62 = arith.cmpi eq, %arg1, %c1_i32 : i32
    %63 = arith.extui %62 : i1 to i32
    %c0_i32_34 = arith.constant 0 : i32
    %64 = arith.cmpi ne, %63, %c0_i32_34 : i32
    scf.if %64 {
      %c0_35 = arith.constant 0 : index
      %c0_36 = arith.constant 0 : index
      %65 = vector.load %arg10[%c0_35, %c0_36] : memref<16x128xf32, #tpu.memory_space<vmem>>, vector<16x128xf32>
      tpu.vector_store %arg10[%c0_35, %c0_36], %60 {strides = array<i32>} : memref<16x128xf32, #tpu.memory_space<vmem>>, vector<16x128xf32>,
    } else {
    }
    return
  }
  func.func @transform_0(%arg0: i32, %arg1: i32) -> (i32, i32) {
    %c0_i32 = arith.constant 0 : i32
    %c0_i32_0 = arith.constant 0 : i32
    return %arg0, %c0_i32 : i32, i32
  }
  func.func @transform_1(%arg0: i32, %arg1: i32) -> (i32, i32) {
    %c0_i32 = arith.constant 0 : i32
    %c0_i32_0 = arith.constant 0 : i32
    return %arg0, %c0_i32 : i32, i32
  }
  func.func @transform_2(%arg0: i32, %arg1: i32) -> (i32, i32, i32) {
    %c0_i32 = arith.constant 0 : i32
    %c0_i32_0 = arith.constant 0 : i32
    %c0_i32_1 = arith.constant 0 : i32
    return %arg1, %c0_i32, %c0_i32_0 : i32, i32, i32
  }
  func.func @transform_3(%arg0: i32, %arg1: i32) -> (i32, i32, i32) {
    %c0_i32 = arith.constant 0 : i32
    %c0_i32_0 = arith.constant 0 : i32
    %c0_i32_1 = arith.constant 0 : i32
    return %arg1, %c0_i32, %c0_i32_0 : i32, i32, i32
  }
  func.func @transform_4(%arg0: i32, %arg1: i32) -> (i32, i32, i32) {
    %c0_i32 = arith.constant 0 : i32
    %c0_i32_0 = arith.constant 0 : i32
    %c0_i32_1 = arith.constant 0 : i32
    return %arg1, %c0_i32, %c0_i32_0 : i32, i32, i32
  }
  func.func @transform_5(%arg0: i32, %arg1: i32) -> (i32, i32, i32) {
    %c0_i32 = arith.constant 0 : i32
    %c0_i32_0 = arith.constant 0 : i32
    %c0_i32_1 = arith.constant 0 : i32
    return %arg1, %c0_i32, %c0_i32_0 : i32, i32, i32
  }
  func.func @transform_6(%arg0: i32, %arg1: i32) -> (i32, i32, i32) {
    %c0_i32 = arith.constant 0 : i32
    %c0_i32_0 = arith.constant 0 : i32
    %c0_i32_1 = arith.constant 0 : i32
    return %arg1, %c0_i32, %c0_i32_0 : i32, i32, i32
  }
  func.func @transform_7(%arg0: i32, %arg1: i32) -> (i32, i32, i32) {
    %c0_i32 = arith.constant 0 : i32
    %c0_i32_0 = arith.constant 0 : i32
    %c0_i32_1 = arith.constant 0 : i32
    return %arg1, %c0_i32, %c0_i32_0 : i32, i32, i32
  }
  func.func @transform_8(%arg0: i32, %arg1: i32) -> (i32, i32) {
    %c0_i32 = arith.constant 0 : i32
    %c0_i32_0 = arith.constant 0 : i32
    return %arg0, %c0_i32 : i32, i32
  }
}

</mosaic_0001>

<bundles_post_ra>
// kernel: tpu_custom_call.1
= control target key start
LH: loop header
LB: loop body
LE: loop exit
PB: predicated region body
PF: predicated region fallthrough
CT: control target
= control target key end

     0   :  { %s1928_s0 = inlined_call_operand.vmem [shape: f32[16,128], index: 0, kind: input, shape index: {}]   ;;  %s1929_s1 = inlined_call_operand.vmem [shape: f32[16,1], index: 1, kind: input, shape index: {}]   ;;  %s1930_s2 = inlined_call_operand.hbm [shape: f32[2,1,128], index: 2, kind: input, shape index: {}]   ;;  %s1931_s3 = inlined_call_operand.hbm [shape: f32[2,1,128], index: 3, kind: input, shape index: {}]   ;;  %s1932_s4 = inlined_call_operand.hbm [shape: bf16[2,128,256], index: 4, kind: input, shape index: {}]   ;;  %s1933_s5 = inlined_call_operand.vmem [shape: f32[2,1,256], index: 5, kind: input, shape index: {}]   ;;  %s1934_s6 = inlined_call_operand.hbm [shape: bf16[2,256,128], index: 6, kind: input, shape index: {}]   ;;  %s1935_s7 = inlined_call_operand.vmem [shape: f32[2,1,128], index: 7, kind: input, shape index: {}]   ;;  %s1936_s8 = inlined_call_operand.hbm [shape: f32[16,128], index: 8, kind: output, shape index: {}]  }
   0x1   :  { %1941 = sst [smem:[#allocation21_spill]] %s1930_s2 }
   0x2   :  { %1942 = sst [smem:[#allocation22_spill]] %s1931_s3 }
   0x3   :  { %13 = vsyncpa [#allocation4], 0 }
   0x4   :  { %15 = vsyncpa [#allocation4 + $0x1], 0 }
   0x5   :  { %16 = vsyncpa [#allocation7], 0 }
   0x6   :  { %18 = vsyncpa [#allocation7 + $0x1], 0 }
   0x7   :  { %19 = vsyncpa [#allocation10], 0 }
   0x8   :  { %21 = vsyncpa [#allocation10 + $0x1], 0 }
   0x9   :  { %22 = vsyncpa [#allocation5], 0  ;;  %s1675_s27 = smov 0   ;;  %s1677_s28 = smov 0  }
   0xa   :  { %s1679_s29 = smov 0   ;;  %s1681_s30 = smov 0  }
   0xb   :  { %s1683_s9 = smov 0   ;;  %s1685_s10 = smov 0  }
   0xc LB: > { %1943 = sst [smem:[#allocation16_spill]] %s1607_s29  ;;  %s1704_s11 = sadd.s32 4294967295, %s1619_s10   ;;  %s1619_s10 = sphi %s1685_s10, %s28_s10   ;;  %s1615_s9 = sphi %s1683_s9, %s1957_s9   ;;  %s1611_s30 = sphi %s1681_s30, %s1956_s30   ;;  %s1607_s29 = sphi %s1679_s29, %s1955_s29   ;;  %s1603_s28 = sphi %s1677_s28, %s1959_s28   ;;  %s1599_s27 = sphi %s1675_s27, %s1958_s27  }
   0xd   : > { %1944 = sst [smem:[#allocation17_spill]] %s1615_s9  ;;  %s37_s12 = sadd.s32 1, %s1615_s9 }
   0xe   : > { %1945 = sst [smem:[#allocation18_spill]] %s1619_s10  ;;  %p38_p0 = scmp.ge.s32.totalorder %s37_s12, 2 }
   0xf   : > { %s99_s13 = sadd.s32 1, %s1607_s29  ;;  %p106_p1 = scmp.ne.s32.totalorder %s1607_s29, %s1603_s28 }
  0x10   : > { %p107_p2 = scmp.eq.s32.totalorder %s1619_s10, 0  ;;  %s1961_s12 = smov (%p38_p0, %s37_s12), 0 }
  0x11   : > { %1946 = sst [smem:[#allocation19_spill]] %s1961_s12  ;;  %p112_p4 = scmp.ne.s32.totalorder %s1603_s28, %s1599_s27 }
  0x12   : > { %p108_p3 = por %p107_p2, %p106_p1  ;;  %s96_s14 = ssub.s32 %s1615_s9, %s1961_s12 }
  0x13   : > { %p113_p5 = scmp.eq.s32.totalorder %s1704_s11, 0  ;;  %p97_p6 = scmp.eq.s32.totalorder %s96_s14, 0 }
  0x14   : > { %p1330_p8 = scmp.lt.s32.totalorder %s1619_s10, 2  ;;  %s1726_s17 = sand.u32 1, %s1607_s29  }
  0x15   : > { %p1717_p7 = por %p113_p5, %p112_p4  ;;  %s327_s19 = sand.u32 1, %s1619_s10  }
  0x16   : > { %s1723_s16 = scalar_select %p97_p6, %s1607_s29, %s99_s13  }
  0x17   : > { %p1728_p9 = pnand %p1330_p8, %p108_p3  ;;  %s1950_s3 = sld [smem:[#allocation22_spill]] }
  0x18   : > { %1948 = sst [smem:[#allocation20_spill]] %s1723_s16  ;;  %s330_s23 = scalar_lea.vmem [#allocation6], %s1726_s17 }
  0x19   : > { %s337_s24 = sshll.u32 %s330_s23, 4  ;;  %p1133_p10 = scmp.ge.s32.totalorder %s1619_s10, 1  ;;  %s338_s24 = int_to_ptr.vmem [resolvable:$true] %s337_s24 }
  0x1a   : > { %s328_s26 = scalar_lea.sflag [#allocation7], %s327_s19  ;;  %p399_p11 = scmp.lt.s32.totalorder %s1619_s10, 3 }
  0x1b   : > { %s1952_s2 = sld [smem:[#allocation21_spill]]  ;;  %s313_s21 = scalar_lea.vmem [#allocation3], %s1726_s17 }
  0x1c   : > { %p1742_p12 = pnand %p1133_p10, %p399_p11  ;;  %s320_s23 = sshll.u32 %s313_s21, 4  ;;  %s321_s23 = int_to_ptr.vmem [resolvable:$true] %s320_s23 }
  0x1d   : > { %s333_s22 = scalar_lea.hbm %s1950_s3, %s1615_s9  ;;  %s1127_s3 = sshll.u32 %s1726_s17, 7 }
  0x1e   : > { %s335_s25 = sshll.u32 %s333_s22, 4  ;;  %s311_s12 = scalar_lea.sflag [#allocation4], %s1726_s17  ;;  %s336_s25 = int_to_ptr.hbm [resolvable:$true] %s335_s25 }
  0x1f   : > { %1323 = dma.hbm_to_vmem [thread:$0]  (!%p1728_p9), %s336_s25, 16, %s338_s24, %s328_s26  }
  0x20   : > { %s1271_s19 = sshll.u32 %s1615_s9, 7  ;;  %s348_s29 = scalar_lea.vmem [#allocation8], %s1127_s3 }
  0x21   : > { %s316_s20 = scalar_lea.hbm %s1952_s2, %s1615_s9  ;;  %s353_s16 = scalar_lea.hbm %s1932_s4, %s1271_s19 }
  0x22   : > { %s318_s22 = sshll.u32 %s316_s20, 4  ;;  %s356_s10 = sshll.u32 %s348_s29, 4  ;;  %s319_s22 = int_to_ptr.hbm [resolvable:$true] %s318_s22  ;;  %s357_s10 = int_to_ptr.vmem [resolvable:$true] %s356_s10 }
  0x23   : > { %1320 = dma.hbm_to_vmem [thread:$0]  (!%p1728_p9), %s319_s22, 16, %s321_s23, %s311_s12  }
  0x24   : > { %s354_s13 = sshll.u32 %s353_s16, 4  ;;  %s1621_s14 = smov 128   ;;  %s355_s13 = int_to_ptr.hbm [resolvable:$true] %s354_s13 }
  0x25   : > { %s1622_s20 = smov 8   ;;  %s382_s12 = scalar_lea.hbm %s1934_s6, %s1271_s19 }
  0x26   : > { %1326 = dma.hbm_to_vmem [thread:$0]  (!%p1728_p9), %s355_s13, 2048, %s357_s10, %s328_s26, %s1621_s14, %s1621_s14, %s1622_s20  }
  0x27   : > { %s383_s23 = sshll.u32 %s382_s12, 4  ;;  %s377_s22 = scalar_lea.vmem [#allocation9], %s1127_s3  ;;  %s384_s23 = int_to_ptr.hbm [resolvable:$true] %s383_s23 }
  0x28   : > { %s385_s9 = sshll.u32 %s377_s22, 4  ;;  %s374_s24 = scalar_lea.sflag [#allocation10], %s1726_s17  ;;  %s386_s9 = int_to_ptr.vmem [resolvable:$true] %s385_s9 }
  0x29   : > { %s1623_s25 = smov 64   ;;  %s1624_s29 = smov 4  }
  0x2a   : > { %1329 = dma.hbm_to_vmem [thread:$0]  (!%p1728_p9), %s384_s23, 2048, %s386_s9, %s374_s24, %s1623_s25, %s1623_s25, %s1624_s29  }
  0x2b   : > { %403 = sbr.rel (%p1742_p12) target bundleno = 664 (0x298), region = 52  ;;  %s1770_s10 = sand.u32 (!%p1742_p12), 1, %s1603_s28  }
  0x2c   : > { %s406_s2 = scalar_lea.sflag (!%p1742_p12), [#allocation4], %s1770_s10  ;;  %s408_s16 = scalar_lea.vmem (!%p1742_p12), [#allocation3], %s1770_s10 }
  0x30   : > { %1582 = dma.done.wait (%p1717_p7), %s406_s2, 16  }
  0x31   : > { %1584 = vsyncadd (%p1717_p7), %s406_s2, 4294967280  ;;  %s414_s3 = sand.u32 1, %s1704_s11   ;;  %s417_s17 = scalar_lea.vmem [#allocation6], %s1770_s10 }
  0x32   : > { %s415_s9 = scalar_lea.sflag [#allocation7], %s414_s3 }
  0x33   : > { %1586 = dma.done.wait (%p1717_p7), %s415_s9, 2064  }
  0x34   : > { %1588 = vsyncadd (%p1717_p7), %s415_s9, 4294965232  ;;  %s1134_s18 = sshll.u32 %s1770_s10, 7  ;;  %s434_s27 = scalar_lea.sflag [#allocation10], %s1770_s10 }
  0x35   : > { %s1785_s26 = scalar_lea.vmem [#allocation8], %s1134_s18  ;;  %s1788_s19 = scalar_lea.vmem [#allocation9], %s1134_s18 }
  0x36   : > { %1590 = dma.done.wait (%p1717_p7), %s434_s27, 2048  }
  0x37   : > { %1592 = vsyncadd (%p1717_p7), %s434_s27, 4294965248  ;;  %p508_p13 = scmp.lt.s32.totalorder %s1611_s30, 1  ;;  %p1137_p0 = scmp.ne.s32.totalorder %s1611_s30, 0 }
  0x39   : > { %s1796_s13 = scalar_select %p508_p13, %s1611_s30, 1 }
  0x3a   : > { %519 = sbr.rel (%p1137_p0) target bundleno = 66 (0x42), region = 72 }
  0x3b   : > { %s1136_s14 = sshll.u32 %s1796_s13, 1  ;;  %s514_s12 = scalar_lea.vmem %s1935_s7, %s1796_s13 }
  0x3c   : > { %s1806_s24 = scalar_lea.vmem %s1933_s5, %s1136_s14 }
  0x3f   : > { %v520_v0 = vld [vmem:[%s1928_s0] sm:$0xff]  ;;  %v521_v1 = vld [vmem:[%s1928_s0 + $0x8] sm:$0xff] }
  0x40   : > { %522 = vst [vmem:[#allocation2] sm:$0xff] %v520_v0 }
  0x41   : > { %523 = vst [vmem:[#allocation2 + $0x8] sm:$0xff] %v521_v1 }
  0x42 PF: > { %v1625_v4 = vmov 128.0   ;;  %v1196_v19 = vld [vmem:[%s1785_s26 + $0x70] sm:$0xf]  ;;  %v1288_v20 = vld [vmem:[%s1785_s26 + $0x74] sm:$0xf0]  ;;  %p1266_p1 = scmp.ne.s32.totalorder %s1611_s30, 1 }
  0x43   : > { %1395 = vrcp.f32 %v1625_v4  ;;  %v1287_v21 = vld [vmem:[%s1785_s26 + $0x74] sm:$0xf]  ;;  %v1197_v22 = vor.u32 %v1288_v20, %v1196_v19  ;;  %v1198_v23 = vld [vmem:[%s1785_s26 + $0x78] sm:$0xf0]  ;;  %v1188_v25 = vld [vmem:[%s1785_s26 + $0x60] sm:$0xf] }
  0x44   : > { %v1201_v24 = vor.u32 %v1287_v21, %v1198_v23  ;;  %v1286_v26 = vld [vmem:[%s1785_s26 + $0x64] sm:$0xf0]  ;;  %v1285_v27 = vld [vmem:[%s1785_s26 + $0x64] sm:$0xf]  ;;  %v1190_v29 = vld [vmem:[%s1785_s26 + $0x68] sm:$0xf0] }
  0x45   : > { %688 = vmatpush.bf16.msra.mxu0 %v1197_v22  ;;  %v1189_v28 = vor.u32 %v1286_v26, %v1188_v25  ;;  %v1193_v30 = vor.u32 %v1285_v27, %v1190_v29  ;;  %v1180_v31 = vld [vmem:[%s1785_s26 + $0x50] sm:$0xf]  ;;  %v1284_v32 = vld [vmem:[%s1785_s26 + $0x54] sm:$0xf0]  ;;  %v1283_v33 = vld [vmem:[%s1785_s26 + $0x54] sm:$0xf] }
  0x46   : > { %702 = vmatpush.bf16.msra.mxu1 %v1201_v24  ;;  %v1181_v34 = vor.u32 %v1284_v32, %v1180_v31  ;;  %v1182_v35 = vld [vmem:[%s1785_s26 + $0x58] sm:$0xf0]  ;;  %v1172_v37 = vld [vmem:[%s1785_s26 + $0x40] sm:$0xf]  ;;  %v1282_v38 = vld [vmem:[%s1785_s26 + $0x44] sm:$0xf0] }
  0x47   : > { %v1815_v2 = vld [vmem:[#allocation2] sm:$0xff]  ;;  %v1185_v36 = vor.u32 %v1283_v33, %v1182_v35  ;;  %v1281_v39 = vld [vmem:[%s1785_s26 + $0x44] sm:$0xf]  ;;  %v1173_v40 = vor.u32 %v1282_v38, %v1172_v37  ;;  %v1280_v44 = vld [vmem:[%s1785_s26 + $0x34] sm:$0xf0] }
  0x48   : > { %526 = vadd.xlane.f32.xlu0 %v1815_v2  ;;  %v1818_v3 = vld [vmem:[#allocation2 + $0x8] sm:$0xff]  ;;  %v1174_v41 = vld [vmem:[%s1785_s26 + $0x48] sm:$0xf0]  ;;  %v1164_v43 = vld [vmem:[%s1785_s26 + $0x30] sm:$0xf] }
  0x49   : > { %v1396_v5 = vpop.eup %1395  ;;  %689 = vmatpush.bf16.msra.mxu0 %v1189_v28  ;;  %v1177_v42 = vor.u32 %v1281_v39, %v1174_v41  ;;  %v1279_v45 = vld [vmem:[%s1785_s26 + $0x34] sm:$0xf]  ;;  %v1165_v46 = vor.u32 %v1280_v44, %v1164_v43  ;;  %v1166_v47 = vld [vmem:[%s1785_s26 + $0x38] sm:$0xf0]  ;;  %v1156_v49 = vld [vmem:[%s1785_s26 + $0x20] sm:$0xf] }
  0x4a   : > { %v531_v6 = vmul.f32 128.0, %v1396_v5  ;;  %vm535_vm0 = vweird.f32 %v1396_v5  ;;  %703 = vmatpush.bf16.msra.mxu1 %v1193_v30  ;;  %v1169_v48 = vor.u32 %v1279_v45, %v1166_v47  ;;  %v1278_v50 = vld [vmem:[%s1785_s26 + $0x24] sm:$0xf0]  ;;  %v1277_v51 = vld [vmem:[%s1785_s26 + $0x24] sm:$0xf]  ;;  %v1296_v35 = vld [vmem:[%s1788_s19 + $0x38] sm:$0xff] }
  0x4b   : > { %v1157_v52 = vor.u32 %v1278_v50, %v1156_v49  ;;  %v1158_v53 = vld [vmem:[%s1785_s26 + $0x28] sm:$0xf0]  ;;  %v1148_v55 = vld [vmem:[%s1785_s26 + $0x10] sm:$0xf]  ;;  %v1276_v56 = vld [vmem:[%s1785_s26 + $0x14] sm:$0xf0]  ;;  %886 = vmatpush.bf16.msra.mxu2 %v1296_v35 }
  0x4c   : > { %v532_v7 = vsub.f32 1.0, %v531_v6  ;;  %v1161_v54 = vor.u32 %v1277_v51, %v1158_v53  ;;  %v1275_v57 = vld [vmem:[%s1785_s26 + $0x14] sm:$0xf]  ;;  %v1149_v58 = vor.u32 %v1276_v56, %v1148_v55  ;;  %v1150_v59 = vld [vmem:[%s1785_s26 + $0x18] sm:$0xf0]  ;;  %v1294_v38 = vld [vmem:[%s1788_s19 + $0x28] sm:$0xff] }
  0x4d   : > { %690 = vmatpush.bf16.msra.mxu0 %v1181_v34  ;;  %v1140_v60 = vld [vmem:[%s1785_s26] sm:$0xf]  ;;  %v1274_v61 = vld [vmem:[%s1785_s26 + $0x4] sm:$0xf0]  ;;  %v1153_v62 = vor.u32 %v1275_v57, %v1150_v59  ;;  %v1273_v63 = vld [vmem:[%s1785_s26 + $0x4] sm:$0xf] }
  0x4e   : > { %v533_v8 = vmul.f32 %v1396_v5, %v532_v7  ;;  %704 = vmatpush.bf16.msra.mxu1 %v1185_v36  ;;  %v1142_v0 = vld [vmem:[%s1785_s26 + $0x8] sm:$0xf0]  ;;  %v1141_v4 = vor.u32 %v1274_v61, %v1140_v60  ;;  %v1304_v36 = vld [vmem:[%s1788_s19 + $0x78] sm:$0xff]  ;;  %v1303_v37 = vld [vmem:[%s1788_s19 + $0x70] sm:$0xff] }
  0x4f   : > { %v1145_v6 = vor.u32 %v1273_v63, %v1142_v0  ;;  %v1392_v26 = vld [vmem:[%s408_s16] ss:$0 sm:$0xff]  ;;  %900 = vmatpush.bf16.msra.mxu3 %v1304_v36  ;;  %v1301_v41 = vld [vmem:[%s1788_s19 + $0x60] sm:$0xff]  ;;  %v1300_v43 = vld [vmem:[%s1788_s19 + $0x58] sm:$0xff] }
  0x50   : > { %528 = vadd.xlane.f32.xlu0 %v1818_v3  ;;  %v534_v9 = vadd.f32 %v1396_v5, %v533_v8  ;;  %v1393_v31 = vld [vmem:[%s417_s17] ss:$0 sm:$0xff]  ;;  %v1291_v44 = vld [vmem:[%s1788_s19 + $0x10] sm:$0xff]  ;;  %v1289_v49 = vld [vmem:[%s1788_s19] sm:$0xff] }
  0x51   : > { %691 = vmatpush.bf16.msra.mxu0 %v1173_v40  ;;  %v1302_v39 = vld [vmem:[%s1788_s19 + $0x68] sm:$0xff]  ;;  %v1293_v40 = vld [vmem:[%s1788_s19 + $0x20] sm:$0xff]  ;;  %v1299_v45 = vld [vmem:[%s1788_s19 + $0x50] sm:$0xff] }
  0x52   : > { %v1821_v10 = vsel %vm535_vm0, %v1396_v5, %v534_v9  ;;  %705 = vmatpush.bf16.msra.mxu1 %v1177_v42  ;;  %v1292_v42 = vld [vmem:[%s1788_s19 + $0x18] sm:$0xff]  ;;  %v1298_v47 = vld [vmem:[%s1788_s19 + $0x48] sm:$0xff]  ;;  %v1297_v50 = vld [vmem:[%s1788_s19 + $0x40] sm:$0xff] }
  0x53   : > { %901 = vmatpush.bf16.msra.mxu3 %v1303_v37  ;;  %v916_v59 = vld [vmem:[%s1929_s1] sm:$0xff] }
  0x55   : > { %692 = vmatpush.bf16.msra.mxu0 %v1165_v46  ;;  %v1290_v46 = vld [vmem:[%s1788_s19 + $0x8] sm:$0xff] }
  0x56   : > { %706 = vmatpush.bf16.msra.mxu1 %v1169_v48  ;;  %v602_v48 = vld [vmem:[%s1806_s24] sm:$0x3] }
  0x57   : > { %902 = vmatpush.bf16.msra.mxu3 %v1302_v39  ;;  %v604_v51 = vperm.slane %v602_v48, 0 }
  0x59   : > { %693 = vmatpush.bf16.msra.mxu0 %v1157_v52  ;;  %v605_v52 = vperm.slane %v602_v48, 1 }
  0x5a   : > { %707 = vmatpush.bf16.msra.mxu1 %v1161_v54 }
  0x5b   : > { %903 = vmatpush.bf16.msra.mxu3 %v1301_v41 }
  0x5d   : > { %694 = vmatpush.bf16.msra.mxu0 %v1149_v58 }
  0x5e   : > { %708 = vmatpush.bf16.msra.mxu1 %v1153_v62  ;;  %v1626_v62 = vmov 0  }
  0x5f   : > { %904 = vmatpush.bf16.msra.mxu3 %v1300_v43  ;;  %1390 = vset.pattern.permute.xlu2 %v1626_v62 }
  0x60   : > { %1391 = vset.pattern.permute.xlu0 %v1626_v62  ;;  %920 = vperm.xlu2 %1390, %v916_v59  }
  0x61   : > { %695 = vmatpush.bf16.msra.mxu0 %v1141_v4 }
  0x62   : > { %709 = vmatpush.bf16.msra.mxu1 %v1145_v6 }
  0x63   : > { %905 = vmatpush.bf16.msra.mxu3 %v1299_v45 }
  0x67   : > { %906 = vmatpush.bf16.msra.mxu3 %v1298_v47 }
  0x6b   : > { %907 = vmatpush.bf16.msra.mxu3 %v1297_v50 }
  0xba   : > { %v921_v45 = vpop.permute.xlu2 %920 }
  0xbb   : > { %v527_v11 = vpop.xlane.xlu0 %526 }
  0xbc   : > { %v537_v12 = vmul.f32 %v1821_v10, %v527_v11 }
  0xbe   : > { %v1825_v13 = vsub.f32 %v1815_v2, %v537_v12 }
  0xc0   : > { %v541_v14 = vmul.f32 %v1825_v13, %v1825_v13 }
  0xc2   : > { %543 = vadd.xlane.f32.xlu1 %v541_v14 }
  0xc3   : > { %v529_v15 = vpop.xlane.xlu0 %528 }
  0xc4   : > { %v538_v16 = vmul.f32 %v1821_v10, %v529_v15 }
  0xc6   : > { %v1831_v17 = vsub.f32 %v1818_v3, %v538_v16 }
  0xc8   : > { %v542_v18 = vmul.f32 %v1831_v17, %v1831_v17 }
  0xca   : > { %545 = vadd.xlane.f32.xlu1 %v542_v18 }
 0x135   : > { %v544_v1 = vpop.xlane.xlu1 %543 }
 0x136   : > { %v547_v5 = vmul.f32 %v544_v1, %v1821_v10 }
 0x138   : > { %v549_v7 = vadd.f32 1e-05, %v547_v5 }
 0x13a   : > { %1397 = vrsqrt.f32 %v549_v7  ;;  %vm557_vm2 = vweird.f32 %v549_v7 }
 0x13d   : > { %v546_v8 = vpop.xlane.xlu1 %545 }
 0x13e   : > { %v548_v9 = vmul.f32 %v546_v8, %v1821_v10 }
 0x140   : > { %v1398_v11 = vpop.eup %1397  ;;  %v550_v12 = vadd.f32 1e-05, %v548_v9 }
 0x141   : > { %v552_v14 = vmul.f32 %v1398_v11, %v549_v7  ;;  %vm558_vm1 = vweird.f32 %v1398_v11 }
 0x142   : > { %1399 = vrsqrt.f32 %v550_v12  ;;  %vm559_vm3 = vmor %vm557_vm2, %vm558_vm1  ;;  %vm567_vm5 = vweird.f32 %v550_v12 }
 0x143   : > { %v553_v15 = vmul.f32 %v1398_v11, %v552_v14 }
 0x145   : > { %v554_v16 = vmul.f32 0.5, %v553_v15 }
 0x147   : > { %v555_v18 = vsub.f32 1.5, %v554_v16 }
 0x148   : > { %v1400_v19 = vpop.eup %1399 }
 0x149   : > { %v556_v20 = vmul.f32 %v1398_v11, %v555_v18  ;;  %v562_v21 = vmul.f32 %v1400_v19, %v550_v12  ;;  %vm568_vm4 = vweird.f32 %v1400_v19  ;;  %v917_v12 = vld [vmem:[%s1929_s1 + $0x8] sm:$0xff] }
 0x14a   : > { %vm569_vm6 = vmor %vm567_vm5, %vm568_vm4  ;;  %925 = vperm.xlu2 %1390, %v917_v12  }
 0x14b   : > { %v563_v22 = vmul.f32 %v1400_v19, %v562_v21  ;;  %v560_v24 = vsel %vm559_vm3, %v1398_v11, %v556_v20 }
 0x14c   : > { %v571_v10 = vmul.f32 %v560_v24, %v1825_v13 }
 0x14d   : > { %v564_v23 = vmul.f32 0.5, %v563_v22 }
 0x14e   : > { %v577_v30 = vmul.f32 %v1392_v26, %v571_v10 }
 0x14f   : > { %v565_v25 = vsub.f32 1.5, %v564_v23 }
 0x150   : > { %v583_v33 = vadd.f32 %v1393_v31, %v577_v30 }
 0x151   : > { %v566_v27 = vmul.f32 %v1400_v19, %v565_v25 }
 0x153   : > { %v570_v28 = vsel %vm569_vm6, %v1400_v19, %v566_v27 }
 0x154   : > { %v572_v29 = vmul.f32 %v570_v28, %v1831_v17  ;;  %v1295_v17 = vld [vmem:[%s1788_s19 + $0x30] sm:$0xff] }
 0x155   : > { %887 = vmatpush.bf16.msra.mxu2 %v1295_v17 }
 0x156   : > { %v578_v32 = vmul.f32 %v1392_v26, %v572_v29 }
 0x158   : > { %v584_v34 = vadd.f32 %v1393_v31, %v578_v32 }
 0x159   : > { %888 = vmatpush.bf16.msra.mxu2 %v1294_v38 }
 0x15a   : > { %v585_v13 = vpack.c.bf16 %v584_v34, %v583_v33 }
 0x15c   : > { %696 = vmatmul.bf16.vlgmr.msra.gmra.mxu0 %v585_v13  ;;  %710 = vmatmul.bf16.vlgmr.msra.gmra.mxu1 %v585_v13 }
 0x15d   : > { %889 = vmatpush.bf16.msra.mxu2 %v1293_v40  ;;  %v1394_v40 = vld [vmem:[%s514_s12] ss:$0 sm:$0xff] }
 0x161   : > { %890 = vmatpush.bf16.msra.mxu2 %v1292_v42 }
 0x165   : > { %891 = vmatpush.bf16.msra.mxu2 %v1291_v44 }
 0x169   : > { %892 = vmatpush.bf16.msra.mxu2 %v1290_v46 }
 0x16d   : > { %893 = vmatpush.bf16.msra.mxu2 %v1289_v49 }
 0x1d9   : > { %v697_v53 = vpop.f32.mrf.mxu0  ;;  %v711_v54 = vpop.f32.mrf.mxu1 }
 0x1da   : > { %v698_v55 = vadd.f32 %v697_v53, %v604_v51  ;;  %v712_v56 = vadd.f32 %v711_v54, %v605_v52  ;;  %v926_v53 = vpop.permute.xlu2 %925 }
 0x1dc   : > { %v720_v57 = vmul.f32 0.044715, %v698_v55  ;;  %v721_v58 = vmul.f32 0.044715, %v712_v56  ;;  %v716_v30 = vmul.f32 0.5, %v698_v55  ;;  %v717_v33 = vmul.f32 0.5, %v712_v56 }
 0x1de   : > { %v724_v60 = vmul.f32 %v720_v57, %v698_v55  ;;  %v725_v61 = vmul.f32 %v721_v58, %v712_v56 }
 0x1e0   : > { %v728_v63 = vmul.f32 %v724_v60, %v698_v55  ;;  %v729_v0 = vmul.f32 %v725_v61, %v712_v56 }
 0x1e1   : > { %v699_v1 = vpop.f32.mrf.mxu0  ;;  %v713_v4 = vpop.f32.mrf.mxu1 }
 0x1e2   : > { %v700_v5 = vadd.f32 %v699_v1, %v604_v51  ;;  %v714_v6 = vadd.f32 %v713_v4, %v605_v52  ;;  %v732_v7 = vadd.f32 %v728_v63, %v698_v55  ;;  %v733_v8 = vadd.f32 %v729_v0, %v712_v56 }
 0x1e4   : > { %v722_v9 = vmul.f32 0.044715, %v700_v5  ;;  %v723_v11 = vmul.f32 0.044715, %v714_v6  ;;  %v736_v15 = vmul.f32 0.7978846, %v732_v7 }
 0x1e5   : > { %v737_v18 = vmul.f32 0.7978846, %v733_v8  ;;  %v718_v31 = vmul.f32 0.5, %v700_v5  ;;  %v719_v34 = vmul.f32 0.5, %v714_v6 }
 0x1e6   : > { %v726_v14 = vmul.f32 %v722_v9, %v700_v5  ;;  %v727_v16 = vmul.f32 %v723_v11, %v714_v6  ;;  %1401 = vtanh.f32 %v736_v15 }
 0x1e7   : > { %1403 = vtanh.f32 %v737_v18 }
 0x1e8   : > { %v730_v19 = vmul.f32 %v726_v14, %v700_v5  ;;  %v731_v20 = vmul.f32 %v727_v16, %v714_v6 }
 0x1ea   : > { %v734_v21 = vadd.f32 %v730_v19, %v700_v5  ;;  %v735_v22 = vadd.f32 %v731_v20, %v714_v6 }
 0x1ec   : > { %v738_v23 = vmul.f32 0.7978846, %v734_v21  ;;  %v739_v24 = vmul.f32 0.7978846, %v735_v22  ;;  %v1402_v25 = vpop.eup %1401 }
 0x1ed   : > { %v1404_v10 = vpop.eup %1403  ;;  %v744_v26 = vadd.f32 1.0, %v1402_v25 }
 0x1ee   : > { %1405 = vtanh.f32 %v738_v23  ;;  %v745_v28 = vadd.f32 1.0, %v1404_v10 }
 0x1ef   : > { %1407 = vtanh.f32 %v739_v24  ;;  %v748_v35 = vmul.f32 %v744_v26, %v716_v30 }
 0x1f0   : > { %v749_v17 = vmul.f32 %v745_v28, %v717_v33 }
 0x1f4   : > { %v1406_v27 = vpop.eup %1405 }
 0x1f5   : > { %v1408_v29 = vpop.eup %1407  ;;  %v746_v32 = vadd.f32 1.0, %v1406_v27 }
 0x1f6   : > { %v747_v13 = vadd.f32 1.0, %v1408_v29 }
 0x1f7   : > { %v750_v36 = vmul.f32 %v746_v32, %v718_v31 }
 0x1f8   : > { %v751_v37 = vmul.f32 %v747_v13, %v719_v34 }
 0x1f9   : > { %v752_v38 = vpack.c.bf16 %v750_v36, %v748_v35 }
 0x1fa   : > { %v753_v39 = vpack.c.bf16 %v751_v37, %v749_v17 }
 0x1fb   : > { %894 = vmatmul.bf16.vlgmr.msra.gmra.mxu2 %v752_v38 }
 0x1fc   : > { %908 = vmatmul.bf16.vlgmr.msra.gmra.mxu3 %v753_v39 }
 0x27e   : > { %v895_v41 = vpop.f32.mrf.mxu2 }
 0x27f   : > { %v896_v42 = vadd.f32 %v1394_v40, %v895_v41  ;;  %v909_v43 = vpop.f32.mrf.mxu3 }
 0x281   : > { %v910_v44 = vadd.f32 %v909_v43, %v896_v42 }
 0x283   : > { %v914_v46 = vadd.f32 %v910_v44, %v1815_v2 }
 0x285   : > { %v928_v47 = vmul.f32 %v921_v45, %v914_v46 }
 0x286   : > { %v897_v48 = vpop.f32.mrf.mxu2 }
 0x287   : > { %930 = vst [vmem:[#allocation2] sm:$0xff] %v928_v47  ;;  %v898_v49 = vadd.f32 %v1394_v40, %v897_v48  ;;  %v911_v50 = vpop.f32.mrf.mxu3 }
 0x289   : > { %v912_v51 = vadd.f32 %v911_v50, %v898_v49 }
 0x28b   : > { %v915_v52 = vadd.f32 %v912_v51, %v1818_v3  ;;  %935 = sbr.rel (%p1266_p1) target bundleno = 658 (0x292), region = 76 }
 0x28d   : > { %v929_v54 = vmul.f32 %v926_v53, %v915_v52 }
 0x28f   : > { %931 = vst [vmem:[#allocation2 + $0x8] sm:$0xff] %v929_v54 }
 0x290   : > { %936 = vst [vmem:[#allocation11] sm:$0xff] %v928_v47 }
 0x291   : > { %937 = vst [vmem:[#allocation11 + $0x8] sm:$0xff] %v929_v54 }
 0x292 PF: > { %p1331_p2 = scmp.eq.s32.totalorder %s1704_s11, 1  ;;  %s948_s19 = sshll.u32 %s1936_s8, 4  ;;  %s949_s19 = int_to_ptr.hbm [resolvable:$true] %s948_s19 }
 0x293   : > { %s1627_s13 = smov [#allocation11]   ;;  %s1628_s20 = smov 128  }
 0x294   : > { %s946_s14 = sshll.u32 %s1627_s13, 4  ;;  %s1629_s21 = smov 8   ;;  %s947_s14 = int_to_ptr.vmem [resolvable:$true] %s946_s14 }
 0x295   : > { %1314 = dma.vmem_to_hbm [thread:$0]  (%p1331_p2), %s947_s14, 256, %s949_s19, [#allocation5], %s1628_s20, %s1628_s20, %s1629_s21  }
 0x296   : > { %1594 = dma.done.wait (%p1331_p2), [#allocation5], 256  }
 0x297   : > { %1596 = vsyncadd (%p1331_p2), [#allocation5], 4294967040 }
 0x298 PF: > { %s1953_s30 = sld [smem:[#allocation18_spill]]  ;;  %s1958_s27 = smov %s1603_s28 }
 0x299   : > { %s1954_s12 = sld [smem:[#allocation16_spill]] }
 0x29a   : > { %s1955_s29 = sld [smem:[#allocation20_spill]] }
 0x29b   : > { %s1957_s9 = sld [smem:[#allocation19_spill]] }
 0x29e   : > { %s28_s10 = sadd.s32 1, %s1953_s30   ;;  %s1956_s30 = sld [smem:[#allocation17_spill]] }
 0x29f   : > { %p25_p3 = scmp.ge.s32.totalorder %s28_s10, 4   ;;  %s1959_s28 = smov %s1954_s12 }
 0x2a1   :  { %27 = sbr.rel (!%p25_p3) target bundleno = 12 (0xc), region = 147 }
 0x2a6   :  { %965 = vsyncpa [#allocation4], 1 }
 0x2a7   :  { %967 = vsyncpa [#allocation4 + $0x1], 1 }
 0x2a8   :  { %968 = vsyncpa [#allocation7], 1 }
 0x2a9   :  { %970 = vsyncpa [#allocation7 + $0x1], 1 }
 0x2aa   :  { %971 = vsyncpa [#allocation10], 1 }
 0x2ab   :  { %973 = vsyncpa [#allocation10 + $0x1], 1 }
 0x2ac   :  { %974 = vsyncpa [#allocation5], 1 }
 0x2ad   :  { %976 = vsyncpa [#allocation5 + $0x1], 1 }

</bundles_post_ra>
